<compile_context>
chip_gen: v7x
topology: tpu7x:2x2x1
jax: 0.10.0
libtpu: 0.0.40
codegen_flags: <defaults>
</compile_context>

<pallas_src>
import functools

import jax
import jax.numpy as jnp
from jax.experimental import pallas as pl
from jax.experimental.pallas import tpu as pltpu


def _fpfn_kernel(n_full, pred_ref, tgt_ref, loss_ref, so_ref, st_ref, sot_ref):
    """Grid = (batch_tile i, lane_tile k). Accumulates row sums over k."""
    k = pl.program_id(1)

    @pl.when(k == 0)
    def _init():
        so_ref[...] = jnp.zeros_like(so_ref)
        st_ref[...] = jnp.zeros_like(st_ref)
        sot_ref[...] = jnp.zeros_like(sot_ref)

    o = pred_ref[...].astype(jnp.float32)
    t = tgt_ref[...].astype(jnp.float32)

    # Three cross-lane reductions (XLU); everything else is derived from them.
    so_ref[...] += jnp.sum(o, axis=-1, keepdims=True)
    st_ref[...] += jnp.sum(t, axis=-1, keepdims=True)
    sot_ref[...] += jnp.sum(o * t, axis=-1, keepdims=True)

    @pl.when(k == pl.num_programs(1) - 1)
    def _finalize():
        s_o = so_ref[...]
        s_t = st_ref[...]
        s_ot = sot_ref[...]
        fp = s_o - s_ot                 # sum(output * (1 - target))
        fn = s_t - s_ot                 # sum((1 - output) * target)
        sum1 = s_t                      # sum(target)
        sum2 = n_full - s_t             # sum(1 - target), full-N constant
        loss = (jnp.minimum(fp / (sum2 + 1e-6), 100.0) +
                jnp.minimum(fn / (sum1 + 1e-6), 100.0))
        loss_ref[...] = loss


def _pick_tiles(B, N, bytes_per_elem_pair, max_tn, vmem_budget_bytes):
    """Pick (TB, TN, num_k): lane tile must divide N (or be full N)."""
    # Lane (reduction) tiling: whole rows if small enough, else a lane-aligned
    # divisor of N so partial-block padding never corrupts the reductions.
    tn, num_k = N, 1
    if N > max_tn and N % 128 == 0:
        start = (min(max_tn, N) // 128) * 128
        for cand in range(start, 127, -128):
            if N % cand == 0:
                tn, num_k = cand, N // cand
                break
    # Batch (sublane) tiling: largest multiple of 8 whose double-buffered
    # two-input footprint fits the budget (conservative for v7x's 64 MiB VMEM).
    per_row = 2 * tn * bytes_per_elem_pair          # 2 buffers x both inputs
    tb = (vmem_budget_bytes // max(per_row, 1)) // 8 * 8
    tb = max(8, min(1024, tb))
    tb = min(tb, ((B + 7) // 8) * 8)                # no more rows than needed
    return tb, tn, num_k


def fpfn_loss_pallas(output, target, *, max_tn=4096, vmem_budget_bytes=16 << 20):
    """Per-row Fpfn loss, shape (B,), computed in a single Pallas kernel."""
    B, N = output.shape
    assert target.shape == (B, N)

    pair_bytes = output.dtype.itemsize + target.dtype.itemsize
    TB, TN, num_k = _pick_tiles(B, N, pair_bytes, max_tn, vmem_budget_bytes)
    grid = (pl.cdiv(B, TB), num_k)

    kernel = functools.partial(_fpfn_kernel, float(N))

    loss_2d = pl.pallas_call(
        kernel,
        out_shape=jax.ShapeDtypeStruct((B, 1), jnp.float32),
        grid_spec=pltpu.PrefetchScalarGridSpec(
            num_scalar_prefetch=0,
            grid=grid,
            in_specs=[
                pl.BlockSpec((TB, TN), lambda i, k: (i, k)),
                pl.BlockSpec((TB, TN), lambda i, k: (i, k)),
            ],
            # Output block constant along k -> resident accumulator tile.
            out_specs=pl.BlockSpec((TB, 1), lambda i, k: (i, 0)),
            scratch_shapes=[pltpu.VMEM((TB, 1), jnp.float32)] * 3,
        ),
        compiler_params=pltpu.CompilerParams(
            dimension_semantics=("parallel", "arbitrary")),
    )(output, target)   # native dtypes streamed; cast to f32 inside the kernel
    return loss_2d[:, 0]


def fpfn_forward(output, target):
    """Mirrors Fpfn.forward: (mean-over-batch scalar, {'loss': per-row loss})."""
    loss = fpfn_loss_pallas(output, target)       # shape (B,)
    assert loss.ndim == 1
    return jnp.mean(loss, axis=0), {"loss": loss}


def _reference_fpfn(output, target):
    output = output.astype(jnp.float32)
    target = target.astype(jnp.float32)
    sum1 = jnp.sum(target, -1)
    sum2 = jnp.sum(1.0 - target, -1)
    loss = (jnp.minimum(jnp.sum(output * (1.0 - target), -1) / (sum2 + 1e-6), 100.0) +
            jnp.minimum(jnp.sum((1.0 - output) * target, -1) / (sum1 + 1e-6), 100.0))
    return jnp.mean(loss, axis=0), loss


if __name__ == "__main__":
    key = jax.random.PRNGKey(0)
    k1, k2, k3, k4 = jax.random.split(key, 4)

    # Case 1: tile-aligned small shape, whole rows in one lane tile.
    B1, N1 = 8, 128
    out1 = jax.random.uniform(k1, (B1, N1), dtype=jnp.float32)
    tgt1 = (jax.random.uniform(k2, (B1, N1)) > 0.5).astype(jnp.float32)
    mean1, res1 = fpfn_forward(out1, tgt1)
    jax.block_until_ready(mean1)
    jax.block_until_ready(res1["loss"])
    ref_mean1, ref_loss1 = _reference_fpfn(out1, tgt1)
    assert jnp.allclose(res1["loss"], ref_loss1, atol=1e-5, rtol=1e-5)
    assert jnp.allclose(mean1, ref_mean1, atol=1e-5, rtol=1e-5)

    # Case 2: non-multiple-of-8 batch (partial batch tile) with forced lane
    # tiling to exercise the k-axis accumulator / pl.when init-finalize path.
    B2, N2 = 12, 256
    out2 = jax.random.uniform(k3, (B2, N2), dtype=jnp.float32)
    tgt2 = (jax.random.uniform(k4, (B2, N2)) > 0.5).astype(jnp.float32)
    loss2 = fpfn_loss_pallas(out2, tgt2, max_tn=128)
    jax.block_until_ready(loss2)
    _, ref_loss2 = _reference_fpfn(out2, tgt2)
    assert jnp.allclose(loss2, ref_loss2, atol=1e-5, rtol=1e-5)

    print("KERNEL_OK")
</pallas_src>

<mosaic_0001>
module attributes {stable_mosaic.version = 11 : i64} {
  func.func @_fpfn_kernel(%arg0: i32, %arg1: i32, %arg2: memref<8x128xf32, #tpu.memory_space<vmem>>, %arg3: memref<8x128xf32, #tpu.memory_space<vmem>>, %arg4: memref<8x1xf32, #tpu.memory_space<vmem>>, %arg5: memref<8x1xf32, #tpu.memory_space<vmem>>, %arg6: memref<8x1xf32, #tpu.memory_space<vmem>>, %arg7: memref<8x1xf32, #tpu.memory_space<vmem>>) attributes {dimension_semantics = [#tpu.dimension_semantics<parallel>, #tpu.dimension_semantics<arbitrary>], iteration_bounds = array<i64: 1, 1>, scalar_prefetch = 0 : i64, scratch_operands = 3 : i64, tpu.core_type = #tpu.core_type<tc>, window_params = [{transform_indices = @transform_0, window_bounds = array<i64: 8, 128>}, {transform_indices = @transform_1, window_bounds = array<i64: 8, 128>}, {transform_indices = @transform_2, window_bounds = array<i64: 8, 1>}]} {
    %c0_i32 = arith.constant 0 : i32
    %0 = arith.cmpi eq, %arg1, %c0_i32 : i32
    %1 = arith.extui %0 : i1 to i32
    %c0_i32_0 = arith.constant 0 : i32
    %2 = arith.cmpi ne, %1, %c0_i32_0 : i32
    scf.if %2 {
      %cst_20 = arith.constant 0.000000e+00 : f32
      %24 = vector.broadcast %cst_20 : f32 to vector<8x1xf32>
      %c0_21 = arith.constant 0 : index
      %c0_22 = arith.constant 0 : index
      %25 = vector.load %arg5[%c0_21, %c0_22] : memref<8x1xf32, #tpu.memory_space<vmem>>, vector<8x1xf32>
      tpu.vector_store %arg5[%c0_21, %c0_22], %24 {strides = array<i32>} : memref<8x1xf32, #tpu.memory_space<vmem>>, vector<8x1xf32>,
      %cst_23 = arith.constant 0.000000e+00 : f32
      %26 = vector.broadcast %cst_23 : f32 to vector<8x1xf32>
      %c0_24 = arith.constant 0 : index
      %c0_25 = arith.constant 0 : index
      %27 = vector.load %arg6[%c0_24, %c0_25] : memref<8x1xf32, #tpu.memory_space<vmem>>, vector<8x1xf32>
      tpu.vector_store %arg6[%c0_24, %c0_25], %26 {strides = array<i32>} : memref<8x1xf32, #tpu.memory_space<vmem>>, vector<8x1xf32>,
      %cst_26 = arith.constant 0.000000e+00 : f32
      %28 = vector.broadcast %cst_26 : f32 to vector<8x1xf32>
      %c0_27 = arith.constant 0 : index
      %c0_28 = arith.constant 0 : index
      %29 = vector.load %arg7[%c0_27, %c0_28] : memref<8x1xf32, #tpu.memory_space<vmem>>, vector<8x1xf32>
      tpu.vector_store %arg7[%c0_27, %c0_28], %28 {strides = array<i32>} : memref<8x1xf32, #tpu.memory_space<vmem>>, vector<8x1xf32>,
    } else {
    }
    %c0 = arith.constant 0 : index
    %c0_1 = arith.constant 0 : index
    %3 = vector.load %arg2[%c0, %c0_1] : memref<8x128xf32, #tpu.memory_space<vmem>>, vector<8x128xf32>
    %c0_2 = arith.constant 0 : index
    %c0_3 = arith.constant 0 : index
    %4 = vector.load %arg3[%c0_2, %c0_3] : memref<8x128xf32, #tpu.memory_space<vmem>>, vector<8x128xf32>
    %c0_4 = arith.constant 0 : index
    %c0_5 = arith.constant 0 : index
    %5 = vector.load %arg5[%c0_4, %c0_5] : memref<8x1xf32, #tpu.memory_space<vmem>>, vector<8x1xf32>
    %cst = arith.constant dense<0.000000e+00> : vector<8xf32>
    %6 = vector.multi_reduction <add>, %3, %cst [1] : vector<8x128xf32> to vector<8xf32>
    %7 = vector.shape_cast %6 : vector<8xf32> to vector<8x1xf32>
    %8 = arith.addf %5, %7 : vector<8x1xf32>
    %c0_6 = arith.constant 0 : index
    %c0_7 = arith.constant 0 : index
    %9 = vector.load %arg5[%c0_6, %c0_7] : memref<8x1xf32, #tpu.memory_space<vmem>>, vector<8x1xf32>
    tpu.vector_store %arg5[%c0_6, %c0_7], %8 {strides = array<i32>} : memref<8x1xf32, #tpu.memory_space<vmem>>, vector<8x1xf32>,
    %c0_8 = arith.constant 0 : index
    %c0_9 = arith.constant 0 : index
    %10 = vector.load %arg6[%c0_8, %c0_9] : memref<8x1xf32, #tpu.memory_space<vmem>>, vector<8x1xf32>
    %cst_10 = arith.constant dense<0.000000e+00> : vector<8xf32>
    %11 = vector.multi_reduction <add>, %4, %cst_10 [1] : vector<8x128xf32> to vector<8xf32>
    %12 = vector.shape_cast %11 : vector<8xf32> to vector<8x1xf32>
    %13 = arith.addf %10, %12 : vector<8x1xf32>
    %c0_11 = arith.constant 0 : index
    %c0_12 = arith.constant 0 : index
    %14 = vector.load %arg6[%c0_11, %c0_12] : memref<8x1xf32, #tpu.memory_space<vmem>>, vector<8x1xf32>
    tpu.vector_store %arg6[%c0_11, %c0_12], %13 {strides = array<i32>} : memref<8x1xf32, #tpu.memory_space<vmem>>, vector<8x1xf32>,
    %c0_13 = arith.constant 0 : index
    %c0_14 = arith.constant 0 : index
    %15 = vector.load %arg7[%c0_13, %c0_14] : memref<8x1xf32, #tpu.memory_space<vmem>>, vector<8x1xf32>
    %16 = arith.mulf %3, %4 : vector<8x128xf32>
    %cst_15 = arith.constant dense<0.000000e+00> : vector<8xf32>
    %17 = vector.multi_reduction <add>, %16, %cst_15 [1] : vector<8x128xf32> to vector<8xf32>
    %18 = vector.shape_cast %17 : vector<8xf32> to vector<8x1xf32>
    %19 = arith.addf %15, %18 : vector<8x1xf32>
    %c0_16 = arith.constant 0 : index
    %c0_17 = arith.constant 0 : index
    %20 = vector.load %arg7[%c0_16, %c0_17] : memref<8x1xf32, #tpu.memory_space<vmem>>, vector<8x1xf32>
    tpu.vector_store %arg7[%c0_16, %c0_17], %19 {strides = array<i32>} : memref<8x1xf32, #tpu.memory_space<vmem>>, vector<8x1xf32>,
    %c0_i32_18 = arith.constant 0 : i32
    %21 = arith.cmpi eq, %arg1, %c0_i32_18 : i32
    %22 = arith.extui %21 : i1 to i32
    %c0_i32_19 = arith.constant 0 : i32
    %23 = arith.cmpi ne, %22, %c0_i32_19 : i32
    scf.if %23 {
      %c0_20 = arith.constant 0 : index
      %c0_21 = arith.constant 0 : index
      %24 = vector.load %arg5[%c0_20, %c0_21] : memref<8x1xf32, #tpu.memory_space<vmem>>, vector<8x1xf32>
      %c0_22 = arith.constant 0 : index
      %c0_23 = arith.constant 0 : index
      %25 = vector.load %arg6[%c0_22, %c0_23] : memref<8x1xf32, #tpu.memory_space<vmem>>, vector<8x1xf32>
      %c0_24 = arith.constant 0 : index
      %c0_25 = arith.constant 0 : index
      %26 = vector.load %arg7[%c0_24, %c0_25] : memref<8x1xf32, #tpu.memory_space<vmem>>, vector<8x1xf32>
      %27 = arith.subf %24, %26 : vector<8x1xf32>
      %28 = arith.subf %25, %26 : vector<8x1xf32>
      %cst_26 = arith.constant 1.280000e+02 : f32
      %29 = vector.broadcast %cst_26 : f32 to vector<8x1xf32>
      %30 = arith.subf %29, %25 : vector<8x1xf32>
      %cst_27 = arith.constant 9.99999997E-7 : f32
      %31 = vector.broadcast %cst_27 : f32 to vector<8x1xf32>
      %32 = arith.addf %30, %31 : vector<8x1xf32>
      %33 = arith.divf %27, %32 : vector<8x1xf32>
      %cst_28 = arith.constant 1.000000e+02 : f32
      %34 = vector.broadcast %cst_28 : f32 to vector<8x1xf32>
      %35 = arith.minimumf %33, %34 : vector<8x1xf32>
      %cst_29 = arith.constant 9.99999997E-7 : f32
      %36 = vector.broadcast %cst_29 : f32 to vector<8x1xf32>
      %37 = arith.addf %25, %36 : vector<8x1xf32>
      %38 = arith.divf %28, %37 : vector<8x1xf32>
      %cst_30 = arith.constant 1.000000e+02 : f32
      %39 = vector.broadcast %cst_30 : f32 to vector<8x1xf32>
      %40 = arith.minimumf %38, %39 : vector<8x1xf32>
      %41 = arith.addf %35, %40 : vector<8x1xf32>
      %c0_31 = arith.constant 0 : index
      %c0_32 = arith.constant 0 : index
      %42 = vector.load %arg4[%c0_31, %c0_32] : memref<8x1xf32, #tpu.memory_space<vmem>>, vector<8x1xf32>
      tpu.vector_store %arg4[%c0_31, %c0_32], %41 {strides = array<i32>} : memref<8x1xf32, #tpu.memory_space<vmem>>, vector<8x1xf32>,
    } else {
    }
    return
  }
  func.func @transform_0(%arg0: i32, %arg1: i32) -> (i32, i32) {
    %c0_i32 = arith.constant 0 : i32
    return %arg0, %arg1 : i32, i32
  }
  func.func @transform_1(%arg0: i32, %arg1: i32) -> (i32, i32) {
    %c0_i32 = arith.constant 0 : i32
    return %arg0, %arg1 : i32, i32
  }
  func.func @transform_2(%arg0: i32, %arg1: i32) -> (i32, i32) {
    %c0_i32 = arith.constant 0 : i32
    %c0_i32_0 = arith.constant 0 : i32
    return %arg0, %c0_i32 : i32, i32
  }
}

</mosaic_0001>

<bundles_post_ra>
// kernel: tpu_custom_call.1
= control target key start
LH: loop header
LB: loop body
LE: loop exit
PB: predicated region body
PF: predicated region fallthrough
CT: control target
= control target key end

     0   :  { %7 = vsyncpa [#allocation6], 0  ;;  %s194_s0 = inlined_call_operand.hbm [shape: f32[8,128], index: 0, kind: input, shape index: {}]   ;;  %s195_s1 = inlined_call_operand.hbm [shape: f32[8,128], index: 1, kind: input, shape index: {}]   ;;  %s196_s2 = inlined_call_operand.vmem [shape: f32[8,1], index: 2, kind: output, shape index: {}]  }
   0x1   :  { %8 = vsyncpa [#allocation8], 0  ;;  %s142_s9 = smov [#allocation5]   ;;  %s143_s11 = smov [#allocation7]  }
   0x2   :  { %s15_s10 = sshll.u32 %s142_s9, 4  ;;  %s25_s12 = sshll.u32 %s143_s11, 4  ;;  %s16_s10 = int_to_ptr.vmem [resolvable:$true] %s15_s10  ;;  %s26_s12 = int_to_ptr.vmem [resolvable:$true] %s25_s12 }
   0x3   :  { %s94_s15 = scalar_lea.hbm %s194_s0, 128 }
   0x4   :  { %p95_p0 = scmp.ne.s32.totalorder %s194_s0, %s94_s15  ;;  %p98_p1 = scmp.lt.u32.totalorder %s94_s15, %s194_s0 }
   0x6   :  { %p100_p2 = pnand %p98_p1, %p95_p0 }
   0x8   :  { %103 = shalt.err (!%p100_p2)
}
   0x9   :  { %s104_s20 = scalar_lea.vmem %s16_s10, 128  ;;  %p109_p4 = scmp.lt.s32.totalorder %s16_s10, %s16_s10 }
   0xa   :  { %p105_p3 = scmp.ne.s32.totalorder %s16_s10, %s104_s20  ;;  %p110_p5 = scmp.lt.s32.totalorder %s104_s20, %s104_s20 }
   0xc   :  { %p111_p6 = por %p110_p5, %p109_p4 }
   0xe   :  { %p112_p7 = pnand %p111_p6, %p105_p3 }
  0x10   :  { %115 = shalt.err (!%p112_p7)
}
  0x11   :  { %18 = dma.hbm_to_vmem [thread:$0]  %s194_s0, 128, %s16_s10, [#allocation6]  }
  0x12   :  { %s116_s25 = scalar_lea.hbm %s195_s1, 128 }
  0x13   :  { %p117_p8 = scmp.ne.s32.totalorder %s195_s1, %s116_s25  ;;  %p120_p9 = scmp.lt.u32.totalorder %s116_s25, %s195_s1 }
  0x15   :  { %p122_p10 = pnand %p120_p9, %p117_p8 }
  0x17   :  { %125 = shalt.err (!%p122_p10)
}
  0x18   :  { %s126_s30 = scalar_lea.vmem %s26_s12, 128  ;;  %p131_p12 = scmp.lt.s32.totalorder %s26_s12, %s26_s12 }
  0x19   :  { %p127_p11 = scmp.ne.s32.totalorder %s26_s12, %s126_s30  ;;  %p132_p13 = scmp.lt.s32.totalorder %s126_s30, %s126_s30 }
  0x1b   :  { %p133_p0 = por %p132_p13, %p131_p12 }
  0x1d   :  { %p134_p1 = pnand %p133_p0, %p127_p11 }
  0x1f   :  { %137 = shalt.err (!%p134_p1)
}
  0x20   :  { %28 = dma.hbm_to_vmem [thread:$0]  %s195_s1, 128, %s26_s12, [#allocation8]  }
  0x21   :  { %138 = dma.done.wait [#allocation6], 128  }
  0x22   :  { %139 = vsyncadd [#allocation6], 4294967168 }
  0x23   :  { %140 = dma.done.wait [#allocation8], 128  }
  0x24   :  { %141 = vsyncadd [#allocation8], 4294967168  ;;  %vm39_vm0 = vcmask 7168   ;;  %v144_v0 = vmov 0.0   ;;  %v44_v1 = vld [vmem:[#allocation7] sm:$0xff]  ;;  %v43_v2 = vld [vmem:[#allocation5] sm:$0xff] }
  0x25   :  { %41 = vst.msk [vmem:[#allocation3] sm:$0xff] %vm39_vm0, %v144_v0  ;;  %40 = vst.msk [vmem:[#allocation2] sm:$0xff] %vm39_vm0, %v144_v0  ;;  %52 = vadd.xlane.f32.xlu0 %v44_v1  ;;  %v57_v3 = vmul.f32 %v44_v1, %v43_v2 }
  0x26   :  { %42 = vst.msk [vmem:[#allocation4] sm:$0xff] %vm39_vm0, %v144_v0 }
  0x27   :  { %58 = vadd.xlane.f32.xlu1 %v57_v3 }
  0x29   :  { %46 = vadd.xlane.f32.xlu0 %v43_v2 }
  0x2c   :  { %v51_v4 = vld [vmem:[#allocation3] sm:$0xff]  ;;  %v45_v9 = vld [vmem:[#allocation2] sm:$0xff] }
  0x2d   :  { %v56_v6 = vld [vmem:[#allocation4] sm:$0xff] }
  0xb2   :  { %v53_v5 = vpop.xlane.xlu0 %52 }
  0xb3   :  { %v54_v7 = vadd.f32 %v53_v5, %v51_v4 }
  0xb4   :  { %v59_v8 = vpop.xlane.xlu1 %58 }
  0xb5   :  { %55 = vst.msk [vmem:[#allocation3] sm:$0xff] %vm39_vm0, %v54_v7  ;;  %v60_v10 = vadd.f32 %v59_v8, %v56_v6 }
  0xb6   :  { %v47_v11 = vpop.xlane.xlu0 %46 }
  0xb7   :  { %61 = vst.msk [vmem:[#allocation4] sm:$0xff] %vm39_vm0, %v60_v10  ;;  %v48_v12 = vadd.f32 %v47_v11, %v45_v9 }
  0xb9   :  { %50 = vst.msk [vmem:[#allocation2] sm:$0xff] %vm39_vm0, %v48_v12 }
  0xbc   :  { %v66_v13 = vld [vmem:[#allocation3] sm:$0xff] }
  0xbd   :  { %v70_v14 = vsub.f32 128.0, %v66_v13  ;;  %v75_v15 = vadd.f32 1e-06, %v66_v13 }
  0xbe   :  { %v67_v17 = vld [vmem:[#allocation4] sm:$0xff] }
  0xbf   :  { %v71_v16 = vadd.f32 1e-06, %v70_v14  ;;  %90 = vrcp.f32 %v75_v15  ;;  %v69_v19 = vsub.f32 %v66_v13, %v67_v17 }
  0xc0   :  { %v65_v18 = vld [vmem:[#allocation2] sm:$0xff] }
  0xc1   :  { %92 = vrcp.f32 %v71_v16  ;;  %v68_v20 = vsub.f32 %v65_v18, %v67_v17 }
  0xc9   :  { %v91_v21 = vpop.eup %90 }
  0xca   :  { %v77_v22 = vmul.f32 %v91_v21, %v69_v19 }
  0xcb   :  { %v93_v23 = vpop.eup %92 }
  0xcc   :  { %v73_v24 = vmul.f32 %v93_v23, %v68_v20  ;;  %v78_v25 = vmin.f32 %v77_v22, 100.0 }
  0xce   :  { %v74_v26 = vmin.f32 %v73_v24, 100.0 }
  0xd0   :  { %v79_v27 = vadd.f32 %v78_v25, %v74_v26 }
  0xd2   :  { %80 = vst.msk [vmem:[%s196_s2] sm:$0xff] %vm39_vm0, %v79_v27 }
  0xd3   :  { %85 = vsyncpa [#allocation6], 1 }
  0xd4   :  { %86 = vsyncpa [#allocation8], 1 }

</bundles_post_ra>
